<compile_context>
chip_gen: v7x
topology: tpu7x:2x2x1
jax: 0.10.0
libtpu: 0.0.40
codegen_flags: <defaults>
</compile_context>

<pallas_src>
import jax
import jax.numpy as jnp
from jax.experimental import pallas as pl
from jax.experimental.pallas import tpu as pltpu

NUM_VIEWS = 4


def attention_kernel(x_ref, vt_ref, ut_ref, w_ref, o_ref):
    # x_ref : (4B, L)  views stacked row-wise     vt_ref / ut_ref : (L, H)
    # w_ref : (1, H)                              o_ref : (B, L)
    B = o_ref.shape[0]
    xf = x_ref[...]                                     # (4B, L)

    # Fused MXU work across all 4 views (M = 4B, K = L = 128, N = H = 64).
    x1 = jnp.tanh(jnp.dot(xf, vt_ref[...], preferred_element_type=jnp.float32))        # (4B, H)
    x2 = jax.nn.sigmoid(jnp.dot(xf, ut_ref[...], preferred_element_type=jnp.float32))  # (4B, H)
    gated = x1 * x2                                     # (4B, H)
    # Single broadcast of w; reduce over H -> per-row score (== (w.T @ (x1*x2)).T).
    scores = jnp.sum(gated * w_ref[...], axis=-1, keepdims=True)                       # (4B, 1)

    acc = jnp.zeros(o_ref.shape, jnp.float32)
    for i in range(NUM_VIEWS):                          # static unroll; B=8 rows per group
        lo = i * B                                      # sublane-aligned row group
        s = scores[lo:lo + B, :]                        # (B, 1)
        # softmax over the batch axis (matches torch softmax(dim=1) on a (1, B) tensor)
        m = jnp.max(s, axis=0, keepdims=True)
        e = jnp.exp(s - m)
        denom = jnp.sum(e, axis=0, keepdims=True)       # (1, 1)
        attn = e * pl.reciprocal(denom, approx=True)    # (B, 1)
        acc = acc + attn * xf[lo:lo + B, :]             # (B, L)
    o_ref[...] = acc


def attention_module(x, U, V, w):
    """x: (B, 4, L); U, V: (H, L); w: (H, 1). Returns (B, L)."""
    B, nv, L = x.shape
    H = U.shape[0]
    assert nv == NUM_VIEWS
    # Host-side layout plumbing (outside the kernel):
    #   views contiguous along rows -> (4B, L); weights pre-transposed -> (L, H).
    xf = jnp.transpose(x, (1, 0, 2)).reshape(nv * B, L)
    vt = V.T
    ut = U.T
    w_row = w.reshape(1, H)
    return pl.pallas_call(
        attention_kernel,
        out_shape=jax.ShapeDtypeStruct((B, L), jnp.float32),
        in_specs=[
            pl.BlockSpec(memory_space=pltpu.MemorySpace.VMEM),
            pl.BlockSpec(memory_space=pltpu.MemorySpace.VMEM),
            pl.BlockSpec(memory_space=pltpu.MemorySpace.VMEM),
            pl.BlockSpec(memory_space=pltpu.MemorySpace.VMEM),
        ],
        out_specs=pl.BlockSpec(memory_space=pltpu.MemorySpace.VMEM),
    )(xf, vt, ut, w_row)


def xavier_uniform(key, shape):
    fan_out, fan_in = shape[0], shape[1]
    bound = (6.0 / (fan_in + fan_out)) ** 0.5
    return jax.random.uniform(key, shape, jnp.float32, minval=-bound, maxval=bound)


def reference(x, U, V, w):
    # pure-JAX reference mirroring the PyTorch module
    def attn_weight(view):
        x1 = jnp.tanh(V @ view.T)               # (H, B)
        x2 = jax.nn.sigmoid(U @ view.T)         # (H, B)
        s = w.T @ (x1 * x2)                     # (1, B)
        return jax.nn.softmax(s, axis=1)        # softmax over batch
    out = attn_weight(x[:, 0, :]).reshape(-1, 1) * x[:, 0, :]
    for i in range(1, NUM_VIEWS):
        out = out + attn_weight(x[:, i, :]).reshape(-1, 1) * x[:, i, :]
    return out


if __name__ == "__main__":
    B, L, H = 8, 128, 64   # batch, latent_vectors, hidden_units (module defaults L=128, H=64)
    key = jax.random.PRNGKey(0)
    kx, ku, kv, kw = jax.random.split(key, 4)

    x = jax.random.normal(kx, (B, NUM_VIEWS, L), jnp.float32)
    U = xavier_uniform(ku, (H, L))
    V = xavier_uniform(kv, (H, L))
    w = xavier_uniform(kw, (H, 1))

    out = attention_module(x, U, V, w)
    jax.block_until_ready(out)

    ref = reference(x, U, V, w)
    assert out.shape == (B, L)
    # Tolerance relaxed vs strict f32 because the softmax divide uses the EUP
    # approximate reciprocal (pl.reciprocal(..., approx=True)); all other math is f32.
    assert jnp.allclose(out, ref, atol=1e-3, rtol=1e-3), "mismatch vs reference"
    print("KERNEL_OK")
</pallas_src>

<mosaic_0001>
module attributes {stable_mosaic.version = 11 : i64} {
  func.func @attention_kernel(%arg0: memref<32x128xf32, #tpu.memory_space<vmem>>, %arg1: memref<128x64xf32, #tpu.memory_space<vmem>>, %arg2: memref<128x64xf32, #tpu.memory_space<vmem>>, %arg3: memref<1x64xf32, #tpu.memory_space<vmem>>, %arg4: memref<8x128xf32, #tpu.memory_space<vmem>>) attributes {dimension_semantics = [], scalar_prefetch = 0 : i64, scratch_operands = 0 : i64, tpu.core_type = #tpu.core_type<tc>} {
    %c0 = arith.constant 0 : index
    %c0_0 = arith.constant 0 : index
    %0 = vector.load %arg0[%c0, %c0_0] : memref<32x128xf32, #tpu.memory_space<vmem>>, vector<32x128xf32>
    %c0_1 = arith.constant 0 : index
    %c0_2 = arith.constant 0 : index
    %1 = vector.load %arg1[%c0_1, %c0_2] : memref<128x64xf32, #tpu.memory_space<vmem>>, vector<128x64xf32>
    %cst = arith.constant dense<0.000000e+00> : vector<32x64xf32>
    %2 = tpu.matmul %0, %1, %cst {dimension_numbers = #tpu.dot_dimension_numbers<[1], [0], [0], [1], [0, 0, 1, 1], [], []>} : vector<32x128xf32>, vector<128x64xf32>, vector<32x64xf32> -> vector<32x64xf32>
    %3 = math.tanh %2 : vector<32x64xf32>
    %c0_3 = arith.constant 0 : index
    %c0_4 = arith.constant 0 : index
    %4 = vector.load %arg2[%c0_3, %c0_4] : memref<128x64xf32, #tpu.memory_space<vmem>>, vector<128x64xf32>
    %cst_5 = arith.constant dense<0.000000e+00> : vector<32x64xf32>
    %5 = tpu.matmul %0, %4, %cst_5 {dimension_numbers = #tpu.dot_dimension_numbers<[1], [0], [0], [1], [0, 0, 1, 1], [], []>} : vector<32x128xf32>, vector<128x64xf32>, vector<32x64xf32> -> vector<32x64xf32>
    %6 = arith.negf %5 : vector<32x64xf32>
    %7 = math.exp %6 : vector<32x64xf32>
    %cst_6 = arith.constant 1.000000e+00 : f32
    %8 = vector.broadcast %cst_6 : f32 to vector<32x64xf32>
    %9 = arith.addf %8, %7 : vector<32x64xf32>
    %10 = arith.divf %8, %9 : vector<32x64xf32>
    %11 = arith.mulf %3, %10 : vector<32x64xf32>
    %c0_7 = arith.constant 0 : index
    %c0_8 = arith.constant 0 : index
    %12 = vector.load %arg3[%c0_7, %c0_8] : memref<1x64xf32, #tpu.memory_space<vmem>>, vector<1x64xf32>
    %13 = vector.broadcast %12 : vector<1x64xf32> to vector<32x64xf32>
    %14 = arith.mulf %11, %13 : vector<32x64xf32>
    %cst_9 = arith.constant dense<0.000000e+00> : vector<32xf32>
    %15 = vector.multi_reduction <add>, %14, %cst_9 [1] : vector<32x64xf32> to vector<32xf32>
    %16 = vector.shape_cast %15 : vector<32xf32> to vector<32x1xf32>
    %cst_10 = arith.constant 0.000000e+00 : f32
    %17 = vector.broadcast %cst_10 : f32 to vector<8x128xf32>
    %18 = vector.extract_strided_slice %16 {offsets = [0, 0], sizes = [8, 1], strides = [1, 1]} : vector<32x1xf32> to vector<8x1xf32>
    %cst_11 = arith.constant dense<0xFF800000> : vector<1xf32>
    %19 = vector.multi_reduction <maximumf>, %18, %cst_11 [0] : vector<8x1xf32> to vector<1xf32>
    %20 = vector.shape_cast %19 : vector<1xf32> to vector<1x1xf32>
    %21 = vector.broadcast %20 : vector<1x1xf32> to vector<8x1xf32>
    %22 = arith.subf %18, %21 : vector<8x1xf32>
    %23 = math.exp %22 : vector<8x1xf32>
    %cst_12 = arith.constant dense<0.000000e+00> : vector<1xf32>
    %24 = vector.multi_reduction <add>, %23, %cst_12 [0] : vector<8x1xf32> to vector<1xf32>
    %25 = vector.shape_cast %24 : vector<1xf32> to vector<1x1xf32>
    %26 = tpu.reciprocal %25 {approx = true} : vector<1x1xf32> -> vector<1x1xf32>
    %27 = vector.broadcast %26 : vector<1x1xf32> to vector<8x1xf32>
    %28 = arith.mulf %23, %27 : vector<8x1xf32>
    %29 = vector.extract_strided_slice %0 {offsets = [0, 0], sizes = [8, 128], strides = [1, 1]} : vector<32x128xf32> to vector<8x128xf32>
    %30 = vector.broadcast %28 : vector<8x1xf32> to vector<8x128xf32>
    %31 = arith.mulf %30, %29 : vector<8x128xf32>
    %32 = arith.addf %17, %31 : vector<8x128xf32>
    %33 = vector.extract_strided_slice %16 {offsets = [8, 0], sizes = [8, 1], strides = [1, 1]} : vector<32x1xf32> to vector<8x1xf32>
    %cst_13 = arith.constant dense<0xFF800000> : vector<1xf32>
    %34 = vector.multi_reduction <maximumf>, %33, %cst_13 [0] : vector<8x1xf32> to vector<1xf32>
    %35 = vector.shape_cast %34 : vector<1xf32> to vector<1x1xf32>
    %36 = vector.broadcast %35 : vector<1x1xf32> to vector<8x1xf32>
    %37 = arith.subf %33, %36 : vector<8x1xf32>
    %38 = math.exp %37 : vector<8x1xf32>
    %cst_14 = arith.constant dense<0.000000e+00> : vector<1xf32>
    %39 = vector.multi_reduction <add>, %38, %cst_14 [0] : vector<8x1xf32> to vector<1xf32>
    %40 = vector.shape_cast %39 : vector<1xf32> to vector<1x1xf32>
    %41 = tpu.reciprocal %40 {approx = true} : vector<1x1xf32> -> vector<1x1xf32>
    %42 = vector.broadcast %41 : vector<1x1xf32> to vector<8x1xf32>
    %43 = arith.mulf %38, %42 : vector<8x1xf32>
    %44 = vector.extract_strided_slice %0 {offsets = [8, 0], sizes = [8, 128], strides = [1, 1]} : vector<32x128xf32> to vector<8x128xf32>
    %45 = vector.broadcast %43 : vector<8x1xf32> to vector<8x128xf32>
    %46 = arith.mulf %45, %44 : vector<8x128xf32>
    %47 = arith.addf %32, %46 : vector<8x128xf32>
    %48 = vector.extract_strided_slice %16 {offsets = [16, 0], sizes = [8, 1], strides = [1, 1]} : vector<32x1xf32> to vector<8x1xf32>
    %cst_15 = arith.constant dense<0xFF800000> : vector<1xf32>
    %49 = vector.multi_reduction <maximumf>, %48, %cst_15 [0] : vector<8x1xf32> to vector<1xf32>
    %50 = vector.shape_cast %49 : vector<1xf32> to vector<1x1xf32>
    %51 = vector.broadcast %50 : vector<1x1xf32> to vector<8x1xf32>
    %52 = arith.subf %48, %51 : vector<8x1xf32>
    %53 = math.exp %52 : vector<8x1xf32>
    %cst_16 = arith.constant dense<0.000000e+00> : vector<1xf32>
    %54 = vector.multi_reduction <add>, %53, %cst_16 [0] : vector<8x1xf32> to vector<1xf32>
    %55 = vector.shape_cast %54 : vector<1xf32> to vector<1x1xf32>
    %56 = tpu.reciprocal %55 {approx = true} : vector<1x1xf32> -> vector<1x1xf32>
    %57 = vector.broadcast %56 : vector<1x1xf32> to vector<8x1xf32>
    %58 = arith.mulf %53, %57 : vector<8x1xf32>
    %59 = vector.extract_strided_slice %0 {offsets = [16, 0], sizes = [8, 128], strides = [1, 1]} : vector<32x128xf32> to vector<8x128xf32>
    %60 = vector.broadcast %58 : vector<8x1xf32> to vector<8x128xf32>
    %61 = arith.mulf %60, %59 : vector<8x128xf32>
    %62 = arith.addf %47, %61 : vector<8x128xf32>
    %63 = vector.extract_strided_slice %16 {offsets = [24, 0], sizes = [8, 1], strides = [1, 1]} : vector<32x1xf32> to vector<8x1xf32>
    %cst_17 = arith.constant dense<0xFF800000> : vector<1xf32>
    %64 = vector.multi_reduction <maximumf>, %63, %cst_17 [0] : vector<8x1xf32> to vector<1xf32>
    %65 = vector.shape_cast %64 : vector<1xf32> to vector<1x1xf32>
    %66 = vector.broadcast %65 : vector<1x1xf32> to vector<8x1xf32>
    %67 = arith.subf %63, %66 : vector<8x1xf32>
    %68 = math.exp %67 : vector<8x1xf32>
    %cst_18 = arith.constant dense<0.000000e+00> : vector<1xf32>
    %69 = vector.multi_reduction <add>, %68, %cst_18 [0] : vector<8x1xf32> to vector<1xf32>
    %70 = vector.shape_cast %69 : vector<1xf32> to vector<1x1xf32>
    %71 = tpu.reciprocal %70 {approx = true} : vector<1x1xf32> -> vector<1x1xf32>
    %72 = vector.broadcast %71 : vector<1x1xf32> to vector<8x1xf32>
    %73 = arith.mulf %68, %72 : vector<8x1xf32>
    %74 = vector.extract_strided_slice %0 {offsets = [24, 0], sizes = [8, 128], strides = [1, 1]} : vector<32x128xf32> to vector<8x128xf32>
    %75 = vector.broadcast %73 : vector<8x1xf32> to vector<8x128xf32>
    %76 = arith.mulf %75, %74 : vector<8x128xf32>
    %77 = arith.addf %62, %76 : vector<8x128xf32>
    %c0_19 = arith.constant 0 : index
    %c0_20 = arith.constant 0 : index
    %78 = vector.load %arg4[%c0_19, %c0_20] : memref<8x128xf32, #tpu.memory_space<vmem>>, vector<8x128xf32>
    tpu.vector_store %arg4[%c0_19, %c0_20], %77 {strides = array<i32>} : memref<8x128xf32, #tpu.memory_space<vmem>>, vector<8x128xf32>,
    return
  }
}

</mosaic_0001>

<bundles_post_ra>
// kernel: tpu_custom_call.1
= control target key start
LH: loop header
LB: loop body
LE: loop exit
PB: predicated region body
PF: predicated region fallthrough
CT: control target
= control target key end

     0   :  { %s790_s0 = inlined_call_operand.vmem [shape: f32[32,128], index: 0, kind: input, shape index: {}]   ;;  %s791_s1 = inlined_call_operand.vmem [shape: f32[128,64], index: 1, kind: input, shape index: {}]   ;;  %s792_s2 = inlined_call_operand.vmem [shape: f32[128,64], index: 2, kind: input, shape index: {}]   ;;  %s793_s3 = inlined_call_operand.vmem [shape: f32[1,64], index: 3, kind: input, shape index: {}]   ;;  %s794_s4 = inlined_call_operand.hbm [shape: f32[8,128], index: 4, kind: output, shape index: {}]  }
   0x1   :  { %v127_v0 = vld [vmem:[%s792_s2] sm:$0xff]  ;;  %v128_v1 = vld [vmem:[%s792_s2 + $0x8] sm:$0xff]  ;;  %v129_v2 = vld [vmem:[%s792_s2 + $0x10] sm:$0xff] }
   0x2   :  { %v524_v3 = vpack.c.bf16 %v128_v1, %v127_v0  ;;  %v130_v4 = vld [vmem:[%s792_s2 + $0x18] sm:$0xff]  ;;  %v131_v6 = vld [vmem:[%s792_s2 + $0x20] sm:$0xff]  ;;  %v132_v7 = vld [vmem:[%s792_s2 + $0x28] sm:$0xff] }
   0x3   :  { %v528_v5 = vpack.c.bf16 %v130_v4, %v129_v2  ;;  %v22_v8 = vld [vmem:[%s791_s1] sm:$0xff]  ;;  %v23_v9 = vld [vmem:[%s791_s1 + $0x8] sm:$0xff]  ;;  %v24_v11 = vld [vmem:[%s791_s1 + $0x10] sm:$0xff]  ;;  %v532_v13 = vpack.c.bf16 %v132_v7, %v131_v6 }
   0x4   :  { %525 = vmatprep.subr.bf16.mxu1 %v524_v3  ;;  %v492_v10 = vpack.c.bf16 %v23_v9, %v22_v8  ;;  %v25_v12 = vld [vmem:[%s791_s1 + $0x18] sm:$0xff]  ;;  %v26_v15 = vld [vmem:[%s791_s1 + $0x20] sm:$0xff]  ;;  %v27_v16 = vld [vmem:[%s791_s1 + $0x28] sm:$0xff] }
   0x5   :  { %527 = vmatpush3.bf16.msra.mxu1 %v524_v3  ;;  %v496_v14 = vpack.c.bf16 %v25_v12, %v24_v11  ;;  %v133_v17 = vld [vmem:[%s792_s2 + $0x30] sm:$0xff]  ;;  %v134_v18 = vld [vmem:[%s792_s2 + $0x38] sm:$0xff]  ;;  %v500_v19 = vpack.c.bf16 %v27_v16, %v26_v15  ;;  %v692_v20 = vld [vmem:[%s790_s0] sm:$0xff] }
   0x6   :  { %529 = vmatprep.subr.bf16.mxu1 %v528_v5  ;;  %493 = vmatprep.subr.bf16.mxu0 %v492_v10  ;;  %v536_v21 = vpack.c.bf16 %v134_v18, %v133_v17  ;;  %v28_v22 = vld [vmem:[%s791_s1 + $0x30] sm:$0xff]  ;;  %v29_v23 = vld [vmem:[%s791_s1 + $0x38] sm:$0xff]  ;;  %v135_v24 = vld [vmem:[%s792_s2 + $0x40] sm:$0xff] }
   0x7   :  { %495 = vmatpush3.bf16.msra.mxu0 %v492_v10  ;;  %486 = vmatprep.mubr.f32.mxu1 %v692_v20  ;;  %v136_v25 = vld [vmem:[%s792_s2 + $0x48] sm:$0xff]  ;;  %v504_v26 = vpack.c.bf16 %v29_v23, %v28_v22 }
   0x8   :  { %497 = vmatprep.subr.bf16.mxu0 %v496_v14  ;;  %448 = vmatprep.mubr.f32.mxu0 %v692_v20 }
   0x9   :  { %531 = vmatpush3.bf16.msra.mxu1 %v528_v5 }
   0xa   :  { %533 = vmatprep.subr.bf16.mxu1 %v532_v13 }
   0xb   :  { %499 = vmatpush3.bf16.msra.mxu0 %v496_v14 }
   0xc   :  { %501 = vmatprep.subr.bf16.mxu0 %v500_v19 }
   0xd   :  { %535 = vmatpush3.bf16.msra.mxu1 %v532_v13 }
   0xe   :  { %9 = vsyncpa [#allocation3], 0  ;;  %537 = vmatprep.subr.bf16.mxu1 %v536_v21  ;;  %v540_v27 = vpack.c.bf16 %v136_v25, %v135_v24  ;;  %v30_v28 = vld [vmem:[%s791_s1 + $0x40] sm:$0xff]  ;;  %v31_v29 = vld [vmem:[%s791_s1 + $0x48] sm:$0xff]  ;;  %vm267_vm0 = vcmask 523264  }
   0xf   :  { %v137_v30 = vld [vmem:[%s792_s2 + $0x50] sm:$0xff]  ;;  %v138_v31 = vld [vmem:[%s792_s2 + $0x58] sm:$0xff]  ;;  %503 = vmatpush3.bf16.msra.mxu0 %v500_v19  ;;  %v508_v32 = vpack.c.bf16 %v31_v29, %v30_v28  ;;  %v139_v36 = vld [vmem:[%s792_s2 + $0x60] sm:$0xff] }
  0x10   :  { %505 = vmatprep.subr.bf16.mxu0 %v504_v26  ;;  %v544_v33 = vpack.c.bf16 %v138_v31, %v137_v30  ;;  %v32_v34 = vld [vmem:[%s791_s1 + $0x50] sm:$0xff]  ;;  %v33_v35 = vld [vmem:[%s791_s1 + $0x58] sm:$0xff]  ;;  %v140_v37 = vld [vmem:[%s792_s2 + $0x68] sm:$0xff] }
  0x11   :  { %539 = vmatpush3.bf16.msra.mxu1 %v536_v21  ;;  %v512_v38 = vpack.c.bf16 %v33_v35, %v32_v34  ;;  %v548_v39 = vpack.c.bf16 %v140_v37, %v139_v36  ;;  %v34_v40 = vld [vmem:[%s791_s1 + $0x60] sm:$0xff]  ;;  %v35_v41 = vld [vmem:[%s791_s1 + $0x68] sm:$0xff]  ;;  %v141_v42 = vld [vmem:[%s792_s2 + $0x70] sm:$0xff] }
  0x12   :  { %541 = vmatprep.subr.bf16.mxu1 %v540_v27  ;;  %v142_v43 = vld [vmem:[%s792_s2 + $0x78] sm:$0xff]  ;;  %v516_v44 = vpack.c.bf16 %v35_v41, %v34_v40  ;;  %v36_v46 = vld [vmem:[%s791_s1 + $0x70] sm:$0xff]  ;;  %v753_v49 = vld [vmem:[%s790_s0 + $0x8] sm:$0xff] }
  0x13   :  { %507 = vmatpush3.bf16.msra.mxu0 %v504_v26  ;;  %v552_v45 = vpack.c.bf16 %v142_v43, %v141_v42  ;;  %v37_v47 = vld [vmem:[%s791_s1 + $0x78] sm:$0xff]  ;;  %v758_v50 = vld [vmem:[%s790_s0 + $0x10] sm:$0xff]  ;;  %v375_v12 = vld [vmem:[%s793_s3] ss:$0 sm:$0xff]  ;;  %s621_s3 = smov [#allocation2]  }
  0x14   :  { %509 = vmatprep.subr.bf16.mxu0 %v508_v32  ;;  %v520_v48 = vpack.c.bf16 %v37_v47, %v36_v46  ;;  %v765_v51 = vld [vmem:[%s790_s0 + $0x18] sm:$0xff]  ;;  %s363_s8 = sshll.u32 %s621_s3, 4  ;;  %s364_s8 = int_to_ptr.vmem [resolvable:$true] %s363_s8 }
  0x15   :  { %543 = vmatpush3.bf16.msra.mxu1 %v540_v27  ;;  %s597_s9 = scalar_lea.vmem %s364_s8, 128  ;;  %p602_p1 = scmp.lt.s32.totalorder %s364_s8, %s364_s8 }
  0x16   :  { %545 = vmatprep.subr.bf16.mxu1 %v544_v33  ;;  %p598_p0 = scmp.ne.s32.totalorder %s364_s8, %s597_s9  ;;  %p603_p2 = scmp.lt.s32.totalorder %s597_s9, %s597_s9 }
  0x17   :  { %511 = vmatpush3.bf16.msra.mxu0 %v508_v32 }
  0x18   :  { %513 = vmatprep.subr.bf16.mxu0 %v512_v38  ;;  %p604_p3 = por %p603_p2, %p602_p1 }
  0x19   :  { %547 = vmatpush3.bf16.msra.mxu1 %v544_v33 }
  0x1a   :  { %549 = vmatprep.subr.bf16.mxu1 %v548_v39  ;;  %p605_p4 = pnand %p604_p3, %p598_p0 }
  0x1b   :  { %515 = vmatpush3.bf16.msra.mxu0 %v512_v38 }
  0x1c   :  { %517 = vmatprep.subr.bf16.mxu0 %v516_v44 }
  0x1d   :  { %551 = vmatpush3.bf16.msra.mxu1 %v548_v39 }
  0x1e   :  { %553 = vmatprep.subr.bf16.mxu1 %v552_v45 }
  0x1f   :  { %519 = vmatpush3.bf16.msra.mxu0 %v516_v44 }
  0x20   :  { %521 = vmatprep.subr.bf16.mxu0 %v520_v48 }
  0x21   :  { %555 = vmatpush3.bf16.msra.mxu1 %v552_v45 }
  0x23   :  { %523 = vmatpush3.bf16.msra.mxu0 %v520_v48 }
  0x24   :  { %487 = vmatmul.mubr.f32.vlgmr.msra.gmra.mrb[0].mxu1 %v753_v49 }
  0x25   :  { %489 = vmatprep.mubr.f32.mxu1 %v758_v50 }
  0x26   :  { %449 = vmatmul.mubr.f32.vlgmr.msra.gmra.mrb[0].mxu0 %v753_v49 }
  0x27   :  { %451 = vmatprep.mubr.f32.mxu0 %v758_v50 }
  0x28   :  { %490 = vmatmul.mubr.f32.gmra.mrb[2].mxu1 %v765_v51 }
  0x2a   :  { %452 = vmatmul.mubr.f32.gmra.mrb[2].mxu0 %v765_v51 }
  0xf7   :  { %v488_v52 = vpop.f32.mrb[0].mxu1 }
  0xf8   :  { %v372_v53 = vmul.f32 -1.442695, %v488_v52  ;;  %v209_v54 = vpop.f32.mrb[1].mxu1 }
  0xf9   :  { %v371_v55 = vmul.f32 -1.442695, %v209_v54  ;;  %v450_v56 = vpop.f32.mrb[0].mxu0 }
  0xfa   :  { %557 = vpow2.f32 %v372_v53  ;;  %v104_v58 = vpop.f32.mrb[1].mxu0 }
  0xfb   :  { %559 = vpow2.f32 %v371_v55  ;;  %v491_v57 = vpop.f32.mrb[2].mxu1 }
  0xfc   :  { %v374_v59 = vmul.f32 -1.442695, %v491_v57  ;;  %v219_v60 = vpop.f32.mrb[3].mxu1 }
  0xfd   :  { %v373_v61 = vmul.f32 -1.442695, %v219_v60  ;;  %v453_v62 = vpop.f32.mrb[2].mxu0 }
  0xfe   :  { %561 = vpow2.f32 %v374_v59  ;;  %v114_v63 = vpop.f32.mrb[3].mxu0 }
  0xff   :  { %563 = vpow2.f32 %v373_v61 }
 0x100   :  { %565 = vtanh.f32 %v450_v56 }
 0x101   :  { %567 = vtanh.f32 %v104_v58 }
 0x104   :  { %v558_v0 = vpop.eup %557 }
 0x105   :  { %v560_v1 = vpop.eup %559  ;;  %v241_v2 = vadd.f32 1.0, %v558_v0 }
 0x106   :  { %v240_v3 = vadd.f32 1.0, %v560_v1 }
 0x107   :  { %569 = vrcp.f32 %v241_v2 }
 0x108   :  { %v562_v4 = vpop.eup %561  ;;  %571 = vrcp.f32 %v240_v3 }
 0x109   :  { %v564_v5 = vpop.eup %563  ;;  %v243_v6 = vadd.f32 1.0, %v562_v4  ;;  %573 = vtanh.f32 %v453_v62 }
 0x10a   :  { %v242_v7 = vadd.f32 1.0, %v564_v5  ;;  %575 = vtanh.f32 %v114_v63  ;;  %v566_v8 = vpop.eup %565 }
 0x10b   :  { %577 = vrcp.f32 %v243_v6  ;;  %v568_v9 = vpop.eup %567 }
 0x10c   :  { %579 = vrcp.f32 %v242_v7 }
 0x111   :  { %v570_v10 = vpop.eup %569 }
 0x112   :  { %v572_v11 = vpop.eup %571  ;;  %v253_v13 = vmul.f32 %v570_v10, %v566_v8 }
 0x113   :  { %v574_v14 = vpop.eup %573  ;;  %v252_v15 = vmul.f32 %v572_v11, %v568_v9 }
 0x114   :  { %v576_v16 = vpop.eup %575  ;;  %v264_v23 = vmul.f32 %v375_v12, %v253_v13 }
 0x115   :  { %v578_v17 = vpop.eup %577  ;;  %v263_v18 = vmul.f32 %v375_v12, %v252_v15 }
 0x116   :  { %v580_v19 = vpop.eup %579  ;;  %v255_v21 = vmul.f32 %v578_v17, %v574_v14  ;;  %v271_v26 = vsel %vm267_vm0, %v264_v23, 0.0 }
 0x117   :  { %v268_v22 = vsel %vm267_vm0, %v263_v18, 0.0  ;;  %v254_v24 = vmul.f32 %v580_v19, %v576_v16 }
 0x118   :  { %269 = vadd.xlane.f32.xlu0 %v268_v22  ;;  %v266_v28 = vmul.f32 %v375_v12, %v255_v21 }
 0x119   :  { %v265_v25 = vmul.f32 %v375_v12, %v254_v24 }
 0x11a   :  { %v277_v29 = vsel %vm267_vm0, %v266_v28, 0.0 }
 0x11b   :  { %v274_v27 = vsel %vm267_vm0, %v265_v25, 0.0 }
 0x11c   :  { %272 = vadd.xlane.f32.xlu0 %v271_v26  ;;  %275 = vadd.xlane.f32.xlu1 %v274_v27 }
 0x120   :  { %278 = vadd.xlane.f32.xlu1 %v277_v29 }
 0x1a5   :  { %v270_v30 = vpop.xlane.xlu0 %269 }
 0x1a6   :  { %v280_v31 = vrot.slane %v270_v30, 4 }
 0x1a8   :  { %v281_v32 = vmax.f32 %v270_v30, %v280_v31 }
 0x1a9   :  { %v273_v33 = vpop.xlane.xlu0 %272  ;;  %v276_v34 = vpop.xlane.xlu1 %275 }
 0x1aa   :  { %v282_v35 = vrot.slane %v281_v32, 2  ;;  %v299_v36 = vrot.slane %v273_v33, 4  ;;  %v318_v37 = vrot.slane %v276_v34, 4 }
 0x1ac   :  { %v283_v38 = vmax.f32 %v281_v32, %v282_v35  ;;  %v300_v39 = vmax.f32 %v273_v33, %v299_v36  ;;  %v319_v40 = vmax.f32 %v276_v34, %v318_v37 }
 0x1ad   :  { %v279_v41 = vpop.xlane.xlu1 %278 }
 0x1ae   :  { %v284_v42 = vrot.slane %v283_v38, 1  ;;  %v301_v43 = vrot.slane %v300_v39, 2  ;;  %v320_v44 = vrot.slane %v319_v40, 2  ;;  %v337_v45 = vrot.slane %v279_v41, 4 }
 0x1b0   :  { %v285_v46 = vmax.f32 %v283_v38, %v284_v42  ;;  %v302_v47 = vmax.f32 %v300_v39, %v301_v43  ;;  %v321_v48 = vmax.f32 %v319_v40, %v320_v44  ;;  %v338_v52 = vmax.f32 %v279_v41, %v337_v45 }
 0x1b2   :  { %v286_v53 = vsub.f32 %v270_v30, %v285_v46  ;;  %v303_v54 = vrot.slane %v302_v47, 1  ;;  %v322_v55 = vrot.slane %v321_v48, 1  ;;  %v339_v56 = vrot.slane %v338_v52, 2 }
 0x1b4   :  { %v287_v57 = vmul.f32 1.442695, %v286_v53  ;;  %v304_v58 = vmax.f32 %v302_v47, %v303_v54  ;;  %v323_v59 = vmax.f32 %v321_v48, %v322_v55  ;;  %v340_v60 = vmax.f32 %v338_v52, %v339_v56 }
 0x1b6   :  { %581 = vpow2.f32 %v287_v57  ;;  %v305_v61 = vsub.f32 %v273_v33, %v304_v58  ;;  %v324_v62 = vsub.f32 %v276_v34, %v323_v59  ;;  %v341_v63 = vrot.slane %v340_v60, 1 }
 0x1b8   :  { %v306_v0 = vmul.f32 1.442695, %v305_v61  ;;  %v325_v1 = vmul.f32 1.442695, %v324_v62  ;;  %v342_v2 = vmax.f32 %v340_v60, %v341_v63 }
 0x1ba   :  { %583 = vpow2.f32 %v306_v0  ;;  %v343_v3 = vsub.f32 %v279_v41, %v342_v2 }
 0x1bb   :  { %585 = vpow2.f32 %v325_v1 }
 0x1bc   :  { %v344_v4 = vmul.f32 1.442695, %v343_v3 }
 0x1be   :  { %587 = vpow2.f32 %v344_v4 }
 0x1c0   :  { %v582_v5 = vpop.eup %581 }
 0x1c1   :  { %v289_v6 = vrot.slane %v582_v5, 4 }
 0x1c3   :  { %v290_v7 = vadd.f32 %v582_v5, %v289_v6 }
 0x1c4   :  { %v584_v8 = vpop.eup %583 }
 0x1c5   :  { %v586_v9 = vpop.eup %585  ;;  %v308_v10 = vrot.slane %v584_v8, 4  ;;  %v291_v11 = vrot.slane %v290_v7, 2 }
 0x1c6   :  { %v327_v12 = vrot.slane %v586_v9, 4 }
 0x1c7   :  { %v292_v13 = vadd.f32 %v291_v11, %v290_v7  ;;  %v309_v14 = vadd.f32 %v584_v8, %v308_v10 }
 0x1c8   :  { %v588_v15 = vpop.eup %587  ;;  %v328_v16 = vadd.f32 %v586_v9, %v327_v12 }
 0x1c9   :  { %v293_v17 = vrot.slane %v292_v13, 1  ;;  %v310_v18 = vrot.slane %v309_v14, 2  ;;  %v346_v19 = vrot.slane %v588_v15, 4 }
 0x1ca   :  { %v329_v21 = vrot.slane %v328_v16, 2 }
 0x1cb   :  { %v294_v22 = vadd.f32 %v293_v17, %v292_v13  ;;  %v311_v23 = vadd.f32 %v310_v18, %v309_v14  ;;  %v347_v24 = vadd.f32 %v588_v15, %v346_v19 }
 0x1cc   :  { %v330_v25 = vadd.f32 %v329_v21, %v328_v16 }
 0x1cd   :  { %589 = vrcp.f32 %v294_v22  ;;  %v312_v26 = vrot.slane %v311_v23, 1  ;;  %v348_v27 = vrot.slane %v347_v24, 2 }
 0x1ce   :  { %v331_v28 = vrot.slane %v330_v25, 1 }
 0x1cf   :  { %v313_v29 = vadd.f32 %v312_v26, %v311_v23  ;;  %v349_v30 = vadd.f32 %v348_v27, %v347_v24 }
 0x1d0   :  { %v332_v31 = vadd.f32 %v331_v28, %v330_v25 }
 0x1d1   :  { %591 = vrcp.f32 %v313_v29  ;;  %v350_v32 = vrot.slane %v349_v30, 1 }
 0x1d2   :  { %593 = vrcp.f32 %v332_v31 }
 0x1d3   :  { %v351_v33 = vadd.f32 %v350_v32, %v349_v30 }
 0x1d5   :  { %595 = vrcp.f32 %v351_v33 }
 0x1d7   :  { %v590_v34 = vpop.eup %589 }
 0x1d8   :  { %v296_v35 = vmul.f32 %v590_v34, %v582_v5 }
 0x1da   :  { %v297_v40 = vmul.f32 %v296_v35, %v692_v20 }
 0x1db   :  { %v592_v36 = vpop.eup %591 }
 0x1dc   :  { %v594_v37 = vpop.eup %593  ;;  %v315_v38 = vmul.f32 %v592_v36, %v584_v8 }
 0x1dd   :  { %v334_v39 = vmul.f32 %v594_v37, %v586_v9 }
 0x1de   :  { %v316_v41 = vmul.f32 %v315_v38, %v753_v49 }
 0x1df   :  { %v596_v42 = vpop.eup %595  ;;  %v335_v44 = vmul.f32 %v334_v39, %v758_v50 }
 0x1e0   :  { %v317_v43 = vadd.f32 %v316_v41, %v297_v40  ;;  %v353_v45 = vmul.f32 %v596_v42, %v588_v15 }
 0x1e2   :  { %v336_v46 = vadd.f32 %v335_v44, %v317_v43  ;;  %v354_v47 = vmul.f32 %v353_v45, %v765_v51 }
 0x1e4   :  { %v355_v48 = vadd.f32 %v354_v47, %v336_v46 }
 0x1e6   :  { %356 = vst [vmem:[#allocation2] sm:$0xff] %v355_v48 }
 0x1e7   :  { %608 = shalt.err (!%p605_p4)
}
 0x1e8   :  { %s609_s12 = scalar_lea.hbm %s794_s4, 128 }
 0x1e9   :  { %p610_p5 = scmp.ne.s32.totalorder %s794_s4, %s609_s12  ;;  %p613_p6 = scmp.lt.u32.totalorder %s609_s12, %s794_s4 }
 0x1eb   :  { %p615_p7 = pnand %p613_p6, %p610_p5 }
 0x1ed   :  { %618 = shalt.err (!%p615_p7)
}
 0x1ee   :  { %366 = dma.vmem_to_hbm [thread:$0]  %s364_s8, 128, %s794_s4, [#allocation3]  }
 0x1ef   :  { %619 = dma.done.wait [#allocation3], 128  }
 0x1f0   :  { %620 = vsyncadd [#allocation3], 4294967168 }
 0x1f1   :  { %370 = vsyncpa [#allocation3], 1 }

</bundles_post_ra>
